<compile_context>
chip_gen: v6e
topology: v6e:2x2x1
jax: 0.10.0
libtpu: 0.0.40
codegen_flags: <defaults>
</compile_context>

<pallas_src>
import functools

import jax
import jax.numpy as jnp
import numpy as np
from jax.experimental import pallas as pl
from jax.experimental.pallas import tpu as pltpu


def _scatter_kernel(counts_ref, lidx_ref, feat_ref, out_ref, *, n_tiles):
    b = pl.program_id(0)                 # batch index
    j = pl.program_id(1)                 # spatial tile index
    tile_s = out_ref.shape[-1]
    p_tile = feat_ref.shape[-1]

    count = counts_ref[b * n_tiles + j]  # scalar-prefetched per-tile pillar count

    @pl.when(count == 0)
    def _():
        # Empty BEV tile: pure zero store, no one-hot / matmul work.
        out_ref[...] = jnp.zeros_like(out_ref)

    @pl.when(count > 0)
    def _():
        feat = feat_ref[0]                                # (C, P_TILE), P lane-dense
        lidx = lidx_ref[0]                                # (1, P_TILE) int32, -1 = pad
        # one-hot^T[s, p] = (local_idx[p] == s); single compare + convert, no select.
        pos = jax.lax.broadcasted_iota(jnp.int32, (tile_s, p_tile), 0)
        onehot_t = (lidx == pos).astype(feat.dtype)       # (tile_s, P_TILE)
        tile = jax.lax.dot_general(
            feat, onehot_t,
            dimension_numbers=(((1,), (1,)), ((), ())),   # contract over P_TILE
            preferred_element_type=jnp.float32,
        )                                                 # (C, tile_s) on the MXU
        out_ref[0, :, :] = tile.astype(out_ref.dtype)


def pointpillar_scatter(coords, pillar_features, *, batch_size, num_bev_features,
                        nx, ny, nz=1, tile_s=256, p_tile=None):
    assert nz == 1
    P, C = pillar_features.shape
    assert C == num_bev_features
    S = nz * ny * nx
    tile_s = min(tile_s, S)
    assert S % tile_s == 0
    n_tiles = S // tile_s
    n_buckets = batch_size * n_tiles
    if p_tile is None:
        # With unique pillar coords per batch, a spatial tile of width tile_s holds
        # at most tile_s pillars, so p_tile = tile_s is always sufficient.
        p_tile = tile_s

    dtype = pillar_features.dtype

    # ---- wrapper-side bucketing (plain JAX / XLA ops) ------------------------
    cb = coords[:, 0].astype(jnp.int32)
    flat = (coords[:, 1] + coords[:, 2] * nx + coords[:, 3]).astype(jnp.int32)
    valid = (cb >= 0) & (cb < batch_size)
    combined = jnp.where(valid, cb * S + flat, batch_size * S)   # invalid -> sentinel
    bucket_id = combined // tile_s                               # invalid -> n_buckets
    local_col = combined % tile_s

    # rank of each pillar inside its bucket (sort by combined index, then undo)
    order = jnp.argsort(combined)
    sorted_bucket = bucket_id[order]
    first = jnp.searchsorted(sorted_bucket, sorted_bucket, side="left")
    rank_sorted = (jnp.arange(P, dtype=jnp.int32) - first).astype(jnp.int32)
    rank = jnp.zeros((P,), jnp.int32).at[order].set(rank_sorted)

    in_range = valid & (rank < p_tile)
    gpos = jnp.where(in_range, bucket_id * p_tile + rank, n_buckets * p_tile)

    feat_flat = jnp.zeros((n_buckets * p_tile, C), dtype)
    feat_flat = feat_flat.at[gpos].set(pillar_features, mode="drop")
    bucket_feat = jnp.swapaxes(
        feat_flat.reshape(n_buckets, p_tile, C), 1, 2)           # (NB, C, P_TILE)

    lidx_flat = jnp.full((n_buckets * p_tile,), -1, jnp.int32)
    lidx_flat = lidx_flat.at[gpos].set(local_col, mode="drop")
    bucket_lidx = lidx_flat.reshape(n_buckets, 1, p_tile)        # lane-dense index

    counts = jnp.zeros((n_buckets,), jnp.int32).at[bucket_id].add(
        valid.astype(jnp.int32), mode="drop")

    # ---- pallas call ---------------------------------------------------------
    out_flat = pl.pallas_call(
        functools.partial(_scatter_kernel, n_tiles=n_tiles),
        out_shape=jax.ShapeDtypeStruct((batch_size, C, S), dtype),
        grid_spec=pltpu.PrefetchScalarGridSpec(
            num_scalar_prefetch=1,
            grid=(batch_size, n_tiles),
            in_specs=[
                pl.BlockSpec((1, 1, p_tile), lambda b, j, cnt: (b * n_tiles + j, 0, 0)),
                pl.BlockSpec((1, C, p_tile), lambda b, j, cnt: (b * n_tiles + j, 0, 0)),
            ],
            out_specs=pl.BlockSpec((1, C, tile_s), lambda b, j, cnt: (b, 0, j)),
        ),
        compiler_params=pltpu.CompilerParams(
            dimension_semantics=("parallel", "parallel")),
    )(counts, bucket_lidx, bucket_feat)

    # same flat order as torch .view(B, C*nz, ny, nx)
    return out_flat.reshape(batch_size, C * nz, ny, nx)


def _reference(coords, pillar_features, batch_size, num_bev_features, nx, ny, nz=1):
    coords = np.asarray(coords)
    pf = np.asarray(pillar_features)
    P, C = pf.shape
    out = np.zeros((batch_size, C, nz * nx * ny), dtype=pf.dtype)
    idx = coords[:, 1] + coords[:, 2] * nx + coords[:, 3]
    for p in range(P):
        b = int(coords[p, 0])
        if 0 <= b < batch_size:
            out[b, :, int(idx[p])] = pf[p]
    return out.reshape(batch_size, C * nz, ny, nx)


if __name__ == "__main__":
    # Small shapes consistent with the module config:
    B, C, NX, NY, NZ = 2, 32, 16, 16, 1
    S = NZ * NX * NY
    TILE_S = 128                      # small demo grid; default (256) targets real BEV sizes

    key = jax.random.PRNGKey(0)
    k_feat, k_p0, k_p1 = jax.random.split(key, 3)

    # Unique spatial locations per batch (matches real PointPillars voxelization).
    # Batch 0 only occupies the first spatial tile -> exercises the empty-tile path.
    rows = []
    flat0 = jax.random.permutation(k_p0, TILE_S)[:24]
    flat1 = jax.random.permutation(k_p1, S)[:40]
    for b, flat in ((0, flat0), (1, flat1)):
        y = flat // NX
        x = flat % NX
        z = jnp.zeros_like(flat)
        bcol = jnp.full_like(flat, b)
        rows.append(jnp.stack([bcol, z, y, x], axis=1))
    # padded / invalid rows (batch = -1) must be ignored
    rows.append(jnp.tile(jnp.array([[-1, 0, 0, 0]]), (8, 1)))
    coords = jnp.concatenate(rows, axis=0).astype(jnp.int32)              # (72, 4)
    P = coords.shape[0]
    pillar_features = jax.random.normal(k_feat, (P, C), dtype=jnp.float32)  # (72, 32)

    scatter = jax.jit(functools.partial(
        pointpillar_scatter, batch_size=B, num_bev_features=C,
        nx=NX, ny=NY, nz=NZ, tile_s=TILE_S))

    out = scatter(coords, pillar_features)
    out = jax.block_until_ready(out)

    ref = _reference(coords, pillar_features, B, C, NX, NY, NZ)
    assert out.shape == (B, C * NZ, NY, NX), out.shape
    np.testing.assert_allclose(np.asarray(out), ref, rtol=1e-6, atol=1e-6)
    print("KERNEL_OK")
</pallas_src>

<mosaic_0001>
module attributes {stable_mosaic.version = 11 : i64} {
  func.func private @main(%arg0: i32) attributes {dimension_semantics = [#tpu.dimension_semantics<core_parallel>], iteration_bounds = array<i64: 2>, tpu.core_type = #tpu.core_type<sc_scalar_subcore>, window_params = []} {
    return
  }
}

module attributes {stable_mosaic.version = 11 : i64} {
  func.func private @main(%arg0: i32) attributes {dimension_semantics = [#tpu.dimension_semantics<core_parallel>], iteration_bounds = array<i64: 2>, tpu.core_type = #tpu.core_type<sc_scalar_subcore>, window_params = []} {
    return
  }
}

module attributes {stable_mosaic.version = 11 : i64} {
  func.func @_scatter_kernel(%arg0: i32, %arg1: i32, %arg2: memref<4xi32, #tpu.memory_space<smem>>, %arg3: memref<1x1x128xi32, #tpu.memory_space<vmem>>, %arg4: memref<1x32x128xf32, #tpu.memory_space<vmem>>, %arg5: memref<1x32x128xf32, #tpu.memory_space<vmem>>) attributes {dimension_semantics = [#tpu.dimension_semantics<parallel>, #tpu.dimension_semantics<parallel>], iteration_bounds = array<i64: 2, 2>, scalar_prefetch = 1 : i64, scratch_operands = 0 : i64, tpu.core_type = #tpu.core_type<tc>, window_params = [{transform_indices = @transform_0, window_bounds = array<i64: 1, 1, 128>}, {transform_indices = @transform_1, window_bounds = array<i64: 1, 32, 128>}, {transform_indices = @transform_2, window_bounds = array<i64: 1, 32, 128>}]} {
    %c2_i32 = arith.constant 2 : i32
    %0 = arith.muli %arg0, %c2_i32 : i32
    %1 = arith.addi %0, %arg1 : i32
    %2 = arith.index_cast %1 : i32 to index
    %3 = memref.load %arg2[%2] : memref<4xi32, #tpu.memory_space<smem>>
    %c0_i32 = arith.constant 0 : i32
    %4 = arith.cmpi eq, %3, %c0_i32 : i32
    %5 = arith.extui %4 : i1 to i32
    %c0_i32_0 = arith.constant 0 : i32
    %6 = arith.cmpi ne, %5, %c0_i32_0 : i32
    scf.if %6 {
      %cst = arith.constant 0.000000e+00 : f32
      %10 = vector.broadcast %cst : f32 to vector<1x32x128xf32>
      %c0 = arith.constant 0 : index
      %c0_3 = arith.constant 0 : index
      %c0_4 = arith.constant 0 : index
      %11 = vector.load %arg5[%c0, %c0_3, %c0_4] : memref<1x32x128xf32, #tpu.memory_space<vmem>>, vector<1x32x128xf32>
      tpu.vector_store %arg5[%c0, %c0_3, %c0_4], %10 {strides = array<i32>} : memref<1x32x128xf32, #tpu.memory_space<vmem>>, vector<1x32x128xf32>,
    } else {
    }
    %c0_i32_1 = arith.constant 0 : i32
    %7 = arith.cmpi sgt, %3, %c0_i32_1 : i32
    %8 = arith.extui %7 : i1 to i32
    %c0_i32_2 = arith.constant 0 : i32
    %9 = arith.cmpi ne, %8, %c0_i32_2 : i32
    scf.if %9 {
      %c0 = arith.constant 0 : index
      %c0_3 = arith.constant 0 : index
      %c0_4 = arith.constant 0 : index
      %10 = vector.load %arg4[%c0, %c0_3, %c0_4] : memref<1x32x128xf32, #tpu.memory_space<vmem>>, vector<1x32x128xf32>
      %11 = vector.shape_cast %10 : vector<1x32x128xf32> to vector<32x128xf32>
      %c0_5 = arith.constant 0 : index
      %c0_6 = arith.constant 0 : index
      %c0_7 = arith.constant 0 : index
      %12 = vector.load %arg3[%c0_5, %c0_6, %c0_7] : memref<1x1x128xi32, #tpu.memory_space<vmem>>, vector<1x1x128xi32>
      %13 = vector.shape_cast %12 : vector<1x1x128xi32> to vector<1x128xi32>
      %14 = tpu.iota {dimensions = array<i32: 0>} : vector<128x128xi32>
      %15 = vector.broadcast %13 : vector<1x128xi32> to vector<128x128xi32>
      %16 = arith.cmpi eq, %15, %14 : vector<128x128xi32>
      %17 = arith.extui %16 : vector<128x128xi1> to vector<128x128xi32>
      %18 = arith.sitofp %17 : vector<128x128xi32> to vector<128x128xf32>
      %cst = arith.constant dense<0.000000e+00> : vector<32x128xf32>
      %19 = tpu.matmul %11, %18, %cst {dimension_numbers = #tpu.dot_dimension_numbers<[1], [1], [0], [0], [0, 0, 1, 0], [], []>} : vector<32x128xf32>, vector<128x128xf32>, vector<32x128xf32> -> vector<32x128xf32>
      %c0_8 = arith.constant 0 : index
      %c0_9 = arith.constant 0 : index
      %c0_10 = arith.constant 0 : index
      %20 = vector.load %arg5[%c0_8, %c0_9, %c0_10] : memref<1x32x128xf32, #tpu.memory_space<vmem>>, vector<1x32x128xf32>
      %21 = vector.shape_cast %20 : vector<1x32x128xf32> to vector<32x128xf32>
      %22 = vector.shape_cast %19 : vector<32x128xf32> to vector<1x32x128xf32>
      tpu.vector_store %arg5[%c0_8, %c0_9, %c0_10], %22 {strides = array<i32>} : memref<1x32x128xf32, #tpu.memory_space<vmem>>, vector<1x32x128xf32>,
    } else {
    }
    return
  }
  func.func @transform_0(%arg0: i32, %arg1: i32, %arg2: memref<4xi32, #tpu.memory_space<smem>>) -> (i32, i32, i32) {
    %c2_i32 = arith.constant 2 : i32
    %0 = arith.muli %arg0, %c2_i32 : i32
    %1 = arith.addi %0, %arg1 : i32
    %c0_i32 = arith.constant 0 : i32
    %c0_i32_0 = arith.constant 0 : i32
    %c0_i32_1 = arith.constant 0 : i32
    return %1, %c0_i32, %c0_i32_0 : i32, i32, i32
  }
  func.func @transform_1(%arg0: i32, %arg1: i32, %arg2: memref<4xi32, #tpu.memory_space<smem>>) -> (i32, i32, i32) {
    %c2_i32 = arith.constant 2 : i32
    %0 = arith.muli %arg0, %c2_i32 : i32
    %1 = arith.addi %0, %arg1 : i32
    %c0_i32 = arith.constant 0 : i32
    %c0_i32_0 = arith.constant 0 : i32
    %c0_i32_1 = arith.constant 0 : i32
    return %1, %c0_i32, %c0_i32_0 : i32, i32, i32
  }
  func.func @transform_2(%arg0: i32, %arg1: i32, %arg2: memref<4xi32, #tpu.memory_space<smem>>) -> (i32, i32, i32) {
    %c0_i32 = arith.constant 0 : i32
    %c0_i32_0 = arith.constant 0 : i32
    return %arg0, %c0_i32, %arg1 : i32, i32, i32
  }
}

</mosaic_0001>

<bundles_post_ra>
// kernel: custom-call.1
= control target key start
LH: loop header
LB: loop body
LE: loop exit
PB: predicated region body
PF: predicated region fallthrough
CT: control target
= control target key end

     0   :  { %s6_s0 = inlined_call_operand.vmem [shape: u32[72], index: 0, kind: output, shape index: {}]  }

// kernel: pointpillar_scatter.1
= control target key start
LH: loop header
LB: loop body
LE: loop exit
PB: predicated region body
PF: predicated region fallthrough
CT: control target
= control target key end

     0   :  { %s1025_s0 = inlined_call_operand.vmem [shape: s32[4], index: 0, kind: input, shape index: {}]   ;;  %s1026_s1 = inlined_call_operand.vmem [shape: s32[4,1,128], index: 1, kind: input, shape index: {}]   ;;  %s1027_s2 = inlined_call_operand.vmem [shape: f32[4,32,128], index: 2, kind: input, shape index: {}]   ;;  %s1028_s3 = inlined_call_operand.vmem [shape: f32[2,32,256], index: 3, kind: output, shape index: {}]  }
   0x1   :  { %s8_s14 = sshll.u32 %s1025_s0, 4  ;;  %s9_s14 = int_to_ptr.vmem [resolvable:$true] %s8_s14 }
   0x2   :  { %s713_s15 = scalar_lea.vmem %s9_s14, 16  ;;  %p718_p1 = scmp.lt.s32.totalorder %s9_s14, %s9_s14 }
   0x3   :  { %p714_p0 = scmp.ne.s32.totalorder %s9_s14, %s713_s15  ;;  %p719_p2 = scmp.lt.s32.totalorder %s713_s15, %s713_s15 }
   0x5   :  { %p720_p3 = por %p719_p2, %p718_p1 }
   0x7   :  { %p721_p4 = pnand %p720_p3, %p714_p0 }
   0x9   :  { %724 = shalt.err (!%p721_p4)  }
   0xa   :  { %s783_s16 = smov [#allocation3]  }
   0xb   :  { %11 = dma.vmem_to_smem %s9_s14, 16, %s783_s16, [#allocation2] }
   0xc   :  { %753 = dma.done.wait [#allocation2], 16 }
   0xd   :  { %754 = vsyncadd [#allocation2], 4294967280 }
   0xe   :  { %13 = sfence }
   0xf   :  { %s809_s17 = smov 0   ;;  %s811_s18 = smov 0  }
  0x10   :  { %s813_s19 = smov 0   ;;  %s815_s0 = smov 0  }
  0x11   :  { %s817_s20 = smov 0   ;;  %s819_s21 = smov 0  }
  0x12   :  { %s821_s22 = smov 0  }
  0x13 LB: > { %s28_s23 = sadd.s32 1, %s773_s20  ;;  %s31_s24 = sadd.s32 1, %s777_s21  ;;  %s781_s22 = sphi %s821_s22, %s19_s22   ;;  %s777_s21 = sphi %s819_s21, %s1035_s21   ;;  %s773_s20 = sphi %s817_s20, %s1034_s20   ;;  %s769_s0 = sphi %s815_s0, %s1033_s0   ;;  %s765_s19 = sphi %s813_s19, %s1032_s19   ;;  %s761_s18 = sphi %s811_s18, %s1031_s18   ;;  %s757_s17 = sphi %s809_s17, %s1030_s17  }
  0x14   : > { %p29_p5 = scmp.ge.s32.totalorder %s28_s23, 2  ;;  %s508_s25 = sadd.s32 4294967295, %s781_s22  }
  0x15   : > { %p110_p6 = scmp.ne.s32.totalorder %s761_s18, %s757_s17  ;;  %p111_p7 = scmp.eq.s32.totalorder %s508_s25, 3 }
  0x16   : > { %s1037_s23 = smov (%p29_p5, %s28_s23), 0  ;;  %s1039_s24 = smov (!%p29_p5, %s31_s24), %s777_s21 }
  0x17   : > { %s96_s26 = ssub.s32 %s773_s20, %s1037_s23  ;;  %p33_p8 = scmp.ge.s32.totalorder %s1039_s24, 2 }
  0x18   : > { %p516_p9 = scmp.ge.s32.totalorder %s781_s22, 1  ;;  %p855_p10 = por %p111_p7, %p110_p6 }
  0x19   : > { %p157_p11 = scmp.lt.s32.totalorder %s781_s22, 5  ;;  %s1041_s24 = smov (%p33_p8, %s1039_s24), 0 }
  0x1a   : > { %s95_s28 = ssub.s32 %s777_s21, %s1041_s24  ;;  %s100_s30 = sadd.s32 1, %s761_s18 }
  0x1b   : > { %p158_p12 = pnand %p516_p9, %p157_p11  ;;  %s97_s29 = sor.u32 %s96_s26, %s95_s28 }
  0x1c   : > { %p98_p13 = scmp.eq.s32.totalorder %s97_s29, 0  ;;  %s182_s5 = sand.u32 (!%p158_p12), 1, %s757_s17  }
  0x1d   : > { %161 = sbr.rel (%p158_p12) target bundleno = 330 (0x14a), region = 28  ;;  %s518_s6 = sshll.u32 (!%p158_p12), %s769_s0, 1 }
  0x1e   : > { %s866_s4 = scalar_select %p98_p13, %s761_s18, %s100_s30  }
  0x1f   : > { %s517_s7 = sshll.u32 (!%p158_p12), %s182_s5, 5  ;;  %s186_s8 = sadd.s32 (!%p158_p12), %s765_s19, %s518_s6 }
  0x20   : > { %p187_p0 = scmp.lt.s32.totalorder (!%p158_p12), %s186_s8, 3  ;;  %s203_s9 = sld [smem:[#allocation3 + %s186_s8]] (!%p158_p12) }
  0x21   : > { %s879_s25 = scalar_lea.vmem (!%p158_p12), [#allocation4], %s517_s7 }
  0x22   : > { %s1043_s8 = smov (!%p187_p0, %s186_s8), 3 }
  0x23   : > { %s189_s12 = scalar_lea.vmem %s1026_s1, %s1043_s8  ;;  %s563_s13 = sshll.u32 %s1043_s8, 5 }
  0x24   : > { %s877_s16 = scalar_lea.vmem %s1027_s2, %s563_s13 }
  0x26   : > { %p523_p1 = scmp.ne.s32.totalorder %s203_s9, 0 }
  0x28   : > { %207 = sbr.rel (%p523_p1) target bundleno = 48 (0x30), region = 32 }
  0x2d   : > { %v784_v0 = vmov 0.0  }
  0x2e   : > { %208 = vst [vmem:[%s879_s25] sm:$0xff] %v784_v0  ;;  %209 = vst [vmem:[%s879_s25 + $0x8] sm:$0xff] %v784_v0 }
  0x2f   : > { %210 = vst [vmem:[%s879_s25 + $0x10] sm:$0xff] %v784_v0  ;;  %211 = vst [vmem:[%s879_s25 + $0x18] sm:$0xff] %v784_v0 }
  0x30 PF: > { %p524_p2 = scmp.le.s32.totalorder %s203_s9, 0 }
  0x32   : > { %215 = sbr.rel (%p524_p2) target bundleno = 322 (0x142), region = 36 }
  0x37   : > { %v221_v1 = vlaneseq  ;;  %v216_v2 = vld [vmem:[%s877_s16] sm:$0xff]  ;;  %v218_v3 = vld [vmem:[%s877_s16 + $0x10] sm:$0xff]  ;;  %v785_v9 = vmov 1.0   ;;  %v217_v22 = vld [vmem:[%s877_s16 + $0x8] sm:$0xff] }
  0x38   : > { %616 = vmatprep.mubr.f32.mxu0 %v216_v2  ;;  %619 = vmatprep.mubr.f32.mxu1 %v218_v3  ;;  %v889_v5 = vld [vmem:[%s189_s12] ss:$0 sm:$0xff]  ;;  %v219_v23 = vld [vmem:[%s877_s16 + $0x18] sm:$0xff] }
  0x39   : > { %v887_v4 = vshrl.u32 %v221_v1, 7 }
  0x3b   : > { %v237_v6 = vadd.s32 120, %v887_v4  ;;  %v236_v7 = vadd.s32 112, %v887_v4  ;;  %v235_v8 = vadd.s32 104, %v887_v4  ;;  %v234_v10 = vadd.s32 96, %v887_v4 }
  0x3c   : > { %v233_v11 = vadd.s32 88, %v887_v4  ;;  %v232_v12 = vadd.s32 80, %v887_v4  ;;  %v231_v13 = vadd.s32 72, %v887_v4  ;;  %v230_v14 = vadd.s32 64, %v887_v4 }
  0x3d   : > { %vm257_vm0 = vcmp.eq.s32.totalorder %v889_v5, %v237_v6  ;;  %vm256_vm1 = vcmp.eq.s32.totalorder %v889_v5, %v236_v7  ;;  %vm255_vm2 = vcmp.eq.s32.totalorder %v889_v5, %v235_v8  ;;  %vm254_vm3 = vcmp.eq.s32.totalorder %v889_v5, %v234_v10 }
  0x3e   : > { %584 = vmatprep.subr.msk.mxu0 %vm257_vm0, %v785_v9  ;;  %622 = vmatprep.subr.msk.mxu1 %vm257_vm0, %v785_v9  ;;  %vm253_vm4 = vcmp.eq.s32.totalorder %v889_v5, %v233_v11  ;;  %vm252_vm5 = vcmp.eq.s32.totalorder %v889_v5, %v232_v12  ;;  %vm251_vm6 = vcmp.eq.s32.totalorder %v889_v5, %v231_v13  ;;  %v229_v15 = vadd.s32 56, %v887_v4 }
  0x3f   : > { %585 = vmatpush3.xpose.msk.msra.mxu0 %vm257_vm0, %v785_v9  ;;  %638 = vmatpush3.xpose.msk.msra.mxu1 %vm257_vm0, %v785_v9  ;;  %vm250_vm7 = vcmp.eq.s32.totalorder %v889_v5, %v230_v14  ;;  %v228_v16 = vadd.s32 48, %v887_v4  ;;  %v227_v17 = vadd.s32 40, %v887_v4  ;;  %v226_v18 = vadd.s32 32, %v887_v4 }
  0x40   : > { %586 = vmatprep.subr.msk.mxu0 %vm256_vm1, %v785_v9  ;;  %623 = vmatprep.subr.msk.mxu1 %vm256_vm1, %v785_v9  ;;  %vm249_vm8 = vcmp.eq.s32.totalorder %v889_v5, %v229_v15  ;;  %v225_v19 = vadd.s32 24, %v887_v4  ;;  %v224_v20 = vadd.s32 16, %v887_v4  ;;  %v223_v21 = vadd.s32 8, %v887_v4 }
  0x41   : > { %vm248_vm9 = vcmp.eq.s32.totalorder %v889_v5, %v228_v16  ;;  %vm247_vm10 = vcmp.eq.s32.totalorder %v889_v5, %v227_v17  ;;  %vm246_vm11 = vcmp.eq.s32.totalorder %v889_v5, %v226_v18  ;;  %vm242_vm15 = vcmp.eq.s32.totalorder %v889_v5, %v887_v4 }
  0x42   : > { %vm245_vm12 = vcmp.eq.s32.totalorder %v889_v5, %v225_v19  ;;  %vm244_vm13 = vcmp.eq.s32.totalorder %v889_v5, %v224_v20  ;;  %vm243_vm14 = vcmp.eq.s32.totalorder %v889_v5, %v223_v21 }
  0x43   : > { %587 = vmatpush3.xpose.msk.msra.mxu0 %vm256_vm1, %v785_v9  ;;  %639 = vmatpush3.xpose.msk.msra.mxu1 %vm256_vm1, %v785_v9 }
  0x44   : > { %588 = vmatprep.subr.msk.mxu0 %vm255_vm2, %v785_v9  ;;  %624 = vmatprep.subr.msk.mxu1 %vm255_vm2, %v785_v9 }
  0x47   : > { %589 = vmatpush3.xpose.msk.msra.mxu0 %vm255_vm2, %v785_v9  ;;  %640 = vmatpush3.xpose.msk.msra.mxu1 %vm255_vm2, %v785_v9 }
  0x48   : > { %590 = vmatprep.subr.msk.mxu0 %vm254_vm3, %v785_v9  ;;  %625 = vmatprep.subr.msk.mxu1 %vm254_vm3, %v785_v9 }
  0x4b   : > { %591 = vmatpush3.xpose.msk.msra.mxu0 %vm254_vm3, %v785_v9  ;;  %641 = vmatpush3.xpose.msk.msra.mxu1 %vm254_vm3, %v785_v9 }
  0x4c   : > { %592 = vmatprep.subr.msk.mxu0 %vm253_vm4, %v785_v9  ;;  %626 = vmatprep.subr.msk.mxu1 %vm253_vm4, %v785_v9 }
  0x4f   : > { %593 = vmatpush3.xpose.msk.msra.mxu0 %vm253_vm4, %v785_v9  ;;  %642 = vmatpush3.xpose.msk.msra.mxu1 %vm253_vm4, %v785_v9 }
  0x50   : > { %594 = vmatprep.subr.msk.mxu0 %vm252_vm5, %v785_v9  ;;  %627 = vmatprep.subr.msk.mxu1 %vm252_vm5, %v785_v9 }
  0x53   : > { %595 = vmatpush3.xpose.msk.msra.mxu0 %vm252_vm5, %v785_v9  ;;  %643 = vmatpush3.xpose.msk.msra.mxu1 %vm252_vm5, %v785_v9 }
  0x54   : > { %596 = vmatprep.subr.msk.mxu0 %vm251_vm6, %v785_v9  ;;  %628 = vmatprep.subr.msk.mxu1 %vm251_vm6, %v785_v9 }
  0x57   : > { %597 = vmatpush3.xpose.msk.msra.mxu0 %vm251_vm6, %v785_v9  ;;  %644 = vmatpush3.xpose.msk.msra.mxu1 %vm251_vm6, %v785_v9 }
  0x58   : > { %598 = vmatprep.subr.msk.mxu0 %vm250_vm7, %v785_v9  ;;  %629 = vmatprep.subr.msk.mxu1 %vm250_vm7, %v785_v9 }
  0x5b   : > { %599 = vmatpush3.xpose.msk.msra.mxu0 %vm250_vm7, %v785_v9  ;;  %645 = vmatpush3.xpose.msk.msra.mxu1 %vm250_vm7, %v785_v9 }
  0x5c   : > { %600 = vmatprep.subr.msk.mxu0 %vm249_vm8, %v785_v9  ;;  %630 = vmatprep.subr.msk.mxu1 %vm249_vm8, %v785_v9 }
  0x5f   : > { %601 = vmatpush3.xpose.msk.msra.mxu0 %vm249_vm8, %v785_v9  ;;  %646 = vmatpush3.xpose.msk.msra.mxu1 %vm249_vm8, %v785_v9 }
  0x60   : > { %602 = vmatprep.subr.msk.mxu0 %vm248_vm9, %v785_v9  ;;  %631 = vmatprep.subr.msk.mxu1 %vm248_vm9, %v785_v9 }
  0x63   : > { %603 = vmatpush3.xpose.msk.msra.mxu0 %vm248_vm9, %v785_v9  ;;  %647 = vmatpush3.xpose.msk.msra.mxu1 %vm248_vm9, %v785_v9 }
  0x64   : > { %604 = vmatprep.subr.msk.mxu0 %vm247_vm10, %v785_v9  ;;  %632 = vmatprep.subr.msk.mxu1 %vm247_vm10, %v785_v9 }
  0x67   : > { %605 = vmatpush3.xpose.msk.msra.mxu0 %vm247_vm10, %v785_v9  ;;  %648 = vmatpush3.xpose.msk.msra.mxu1 %vm247_vm10, %v785_v9 }
  0x68   : > { %606 = vmatprep.subr.msk.mxu0 %vm246_vm11, %v785_v9  ;;  %633 = vmatprep.subr.msk.mxu1 %vm246_vm11, %v785_v9 }
  0x6b   : > { %607 = vmatpush3.xpose.msk.msra.mxu0 %vm246_vm11, %v785_v9  ;;  %649 = vmatpush3.xpose.msk.msra.mxu1 %vm246_vm11, %v785_v9 }
  0x6c   : > { %608 = vmatprep.subr.msk.mxu0 %vm245_vm12, %v785_v9  ;;  %634 = vmatprep.subr.msk.mxu1 %vm245_vm12, %v785_v9 }
  0x6f   : > { %609 = vmatpush3.xpose.msk.msra.mxu0 %vm245_vm12, %v785_v9  ;;  %650 = vmatpush3.xpose.msk.msra.mxu1 %vm245_vm12, %v785_v9 }
  0x70   : > { %610 = vmatprep.subr.msk.mxu0 %vm244_vm13, %v785_v9  ;;  %635 = vmatprep.subr.msk.mxu1 %vm244_vm13, %v785_v9 }
  0x73   : > { %611 = vmatpush3.xpose.msk.msra.mxu0 %vm244_vm13, %v785_v9  ;;  %651 = vmatpush3.xpose.msk.msra.mxu1 %vm244_vm13, %v785_v9 }
  0x74   : > { %612 = vmatprep.subr.msk.mxu0 %vm243_vm14, %v785_v9  ;;  %636 = vmatprep.subr.msk.mxu1 %vm243_vm14, %v785_v9 }
  0x77   : > { %613 = vmatpush3.xpose.msk.msra.mxu0 %vm243_vm14, %v785_v9  ;;  %652 = vmatpush3.xpose.msk.msra.mxu1 %vm243_vm14, %v785_v9 }
  0x78   : > { %614 = vmatprep.subr.msk.mxu0 %vm242_vm15, %v785_v9  ;;  %637 = vmatprep.subr.msk.mxu1 %vm242_vm15, %v785_v9 }
  0x7b   : > { %615 = vmatpush3.xpose.msk.msra.mxu0 %vm242_vm15, %v785_v9  ;;  %653 = vmatpush3.xpose.msk.msra.mxu1 %vm242_vm15, %v785_v9 }
  0x7e   : > { %617 = vmatmul.mubr.f32.vlgmr.msra.gmra.mxu0 %v217_v22  ;;  %620 = vmatmul.mubr.f32.vlgmr.msra.gmra.mxu1 %v219_v23 }
 0x13e   : > { %v618_v24 = vpop.f32.mrf.mxu0  ;;  %v621_v25 = vpop.f32.mrf.mxu1 }
 0x13f   : > { %376 = vst [vmem:[%s879_s25 + $0x8] sm:$0xff] %v618_v24  ;;  %378 = vst [vmem:[%s879_s25 + $0x18] sm:$0xff] %v621_v25 }
 0x140   : > { %v356_v26 = vpop.f32.mrf.mxu0  ;;  %v366_v27 = vpop.f32.mrf.mxu1 }
 0x141   : > { %375 = vst [vmem:[%s879_s25] sm:$0xff] %v356_v26  ;;  %377 = vst [vmem:[%s879_s25 + $0x10] sm:$0xff] %v366_v27 }
 0x142 PF: > { %385 = sbr.rel (!%p855_p10) target bundleno = 330 (0x14a), region = 40  ;;  %s559_s17 = sshll.u32 (%p855_p10), %s769_s0, 3 }
 0x143   : > { %s387_s26 = sadd.s32 (%p855_p10), %s765_s19, %s559_s17 }
 0x144   : > { %s560_s28 = sshll.u32 (%p855_p10), %s387_s26, 3 }
 0x145   : > { %s389_s5 = scalar_lea.vmem (%p855_p10), %s1028_s3, %s560_s28 }
 0x146   : > { %v426_v29 = vld [vmem:[%s879_s25 + $0x8] sm:$0xff] (%p855_p10)  ;;  %v430_v31 = vld [vmem:[%s879_s25 + $0x18] sm:$0xff] (%p855_p10) }
 0x147   : > { %427 = vst [vmem:[%s389_s5 + $0x10] sm:$0xff] %v426_v29  ;;  %431 = vst [vmem:[%s389_s5 + $0x30] sm:$0xff] %v430_v31 }
 0x148   : > { %v424_v28 = vld [vmem:[%s879_s25] sm:$0xff]  ;;  %v428_v30 = vld [vmem:[%s879_s25 + $0x10] sm:$0xff] }
 0x149   : > { %425 = vst [vmem:[%s389_s5] sm:$0xff] %v424_v28  ;;  %429 = vst [vmem:[%s389_s5 + $0x20] sm:$0xff] %v428_v30 }
 0x14a PF: > { %s19_s22 = sadd.s32 1, %s781_s22   ;;  %s1030_s17 = smov %s761_s18 }
 0x14b   : > { %p16_p3 = scmp.ge.s32.totalorder %s19_s22, 6   ;;  %s1031_s18 = smov %s866_s4 }
 0x14c   : > { %s1032_s19 = smov %s773_s20  ;;  %s1033_s0 = smov %s777_s21 }
 0x14d   : > { %s1034_s20 = smov %s1037_s23  ;;  %s1035_s21 = smov %s1041_s24 }
 0x14e   :  { %18 = sbr.rel (!%p16_p3) target bundleno = 19 (0x13), region = 107 }

</bundles_post_ra>
